<compile_context>
chip_gen: v7x
topology: tpu7x:2x2x1
jax: 0.10.0
libtpu: 0.0.40
codegen_flags: <defaults>
</compile_context>

<pallas_src>
import functools

import jax
import jax.numpy as jnp
from jax import lax
from jax.experimental import pallas as pl
from jax.experimental.pallas import tpu as pltpu


def _translate_kernel(mask_ref, x_ref, o_ref, *, sy, sx, cb):
    """One grid step = one chunk of `cb` channel planes, shape (cb, H, W).

    mask_ref: scalar-prefetched SMEM int32 (C,), 1 where channel is selected.
    """
    H, W = x_ref.shape[1], x_ref.shape[2]
    base = pl.program_id(0) * cb

    # Hoisted 1-D boundary masks, shared by every plane in the chunk.
    # Row validity depends only on sy, column validity only on sx; skip the
    # iota/compare entirely along an axis whose shift is zero.
    valid = None
    if sy != 0:
        row = lax.broadcasted_iota(jnp.int32, (H, 1), 0)
        valid = (row >= sy) & (row < H + sy)            # 0 <= i - sy < H
    if sx != 0:
        col = lax.broadcasted_iota(jnp.int32, (1, W), 1)
        col_valid = (col >= sx) & (col < W + sx)        # 0 <= j - sx < W
        valid = col_valid if valid is None else (valid & col_valid)

    zero = jnp.zeros((), x_ref.dtype)
    for c in range(cb):                                  # static unroll
        x = x_ref[c]                                     # (H, W)
        shifted = x
        if sx % W != 0:
            shifted = pltpu.roll(shifted, sx % W, axis=1)   # lane roll (XLU)
        if sy % H != 0:
            shifted = pltpu.roll(shifted, sy % H, axis=0)   # sublane roll
        if valid is not None:
            shifted = jnp.where(valid, shifted, zero)
        sel = mask_ref[base + c] != 0                    # scalar SMEM read
        o_ref[c] = jnp.where(sel, shifted, x)            # translate vs passthrough


def translate(x, params, indicies):
    """Pallas equivalent of Translate.forward.

    x:        (1, C, H, W) array
    params:   two floats in [-1, 1]; params[0] = horizontal (width) shift
              fraction, params[1] = vertical (height) shift fraction.
    indicies: iterable of channel indices to translate.
    """
    if (not isinstance(params[0], float) or not isinstance(params[1], float)
            or params[0] < -1 or params[0] > 1
            or params[1] < -1 or params[1] > 1):
        # Matches the PyTorch module: print and continue.
        print('Translation must have two parameters, which should be floats '
              'between -1 and 1.')

    N, C, H, W = x.shape
    assert N == 1, "Translate's squeeze/unsqueeze logic only supports batch=1"

    # `if i in indicies` membership semantics: dedupe, drop out-of-range.
    sel = {int(i) for i in indicies if 0 <= int(i) < C}
    if not sel:
        return x

    sx = int(round(float(params[0]) * W))   # horizontal shift (last axis)
    sy = int(round(float(params[1]) * H))   # vertical shift   (second-last)
    if sx == 0 and sy == 0:
        return x                            # identity fast path

    itemsize = jnp.dtype(x.dtype).itemsize
    plane_bytes = H * W * itemsize

    # Channels per grid step: as many planes as fit a conservative resident
    # VMEM budget (2-deep buffering of input + output), capped to bound the
    # static unroll, and chosen as a divisor of C so the grid tiles evenly.
    vmem_budget = 8 * 1024 * 1024
    cb_cap = max(1, min(C, vmem_budget // max(1, 4 * plane_bytes), 64))
    cb = max(d for d in range(1, cb_cap + 1) if C % d == 0)
    num_chunks = C // cb

    resident = 4 * cb * plane_bytes                      # 2 bufs * (in + out)
    vmem_limit = int(min(64 * 1024 * 1024,               # safe on v7x too
                         max(32 * 1024 * 1024, resident + (4 << 20))))

    chan_mask = jnp.asarray([1 if i in sel else 0 for i in range(C)],
                            jnp.int32)
    x_chw = x[0]                                         # (C, H, W)

    out = pl.pallas_call(
        functools.partial(_translate_kernel, sy=sy, sx=sx, cb=cb),
        out_shape=jax.ShapeDtypeStruct((C, H, W), x.dtype),
        grid_spec=pltpu.PrefetchScalarGridSpec(
            num_scalar_prefetch=1,                       # channel mask -> SMEM
            grid=(num_chunks,),
            in_specs=[pl.BlockSpec((cb, H, W), lambda c, m: (c, 0, 0))],
            out_specs=pl.BlockSpec((cb, H, W), lambda c, m: (c, 0, 0)),
        ),
        compiler_params=pltpu.CompilerParams(
            dimension_semantics=("parallel",),           # planes independent
            vmem_limit_bytes=vmem_limit,
        ),
        cost_estimate=pl.CostEstimate(
            flops=0, transcendentals=0,
            bytes_accessed=2 * C * H * W * itemsize),
    )(chan_mask, x_chw)
    return out[None]


def translate_ref(x, params, indicies):
    """Plain-JAX reference for correctness checking (same assumed semantics)."""
    N, C, H, W = x.shape
    sx = int(round(float(params[0]) * W))
    sy = int(round(float(params[1]) * H))
    shifted = jnp.roll(x, (sy, sx), axis=(2, 3))
    row = jnp.arange(H)
    col = jnp.arange(W)
    row_valid = (row >= sy) & (row < H + sy)
    col_valid = (col >= sx) & (col < W + sx)
    valid = row_valid[:, None] & col_valid[None, :]
    shifted = jnp.where(valid[None, None], shifted, jnp.zeros((), x.dtype))
    chan_sel = jnp.isin(jnp.arange(C), jnp.asarray(list(indicies), jnp.int32))
    return jnp.where(chan_sel[None, :, None, None], shifted, x)


if __name__ == "__main__":
    key = jax.random.PRNGKey(0)
    C, H, W = 4, 16, 128                 # lane-dense W, sublane-aligned H
    x = jax.random.normal(key, (1, C, H, W), dtype=jnp.float32)

    params = [0.25, -0.5]                # shift right by W/4, up by H/2
    indicies = [0, 2]                    # channels to translate

    out = jax.block_until_ready(translate(x, params, indicies))
    ref = translate_ref(x, params, indicies)

    assert out.shape == x.shape and out.dtype == x.dtype
    assert jnp.allclose(out, ref, atol=1e-6), "Pallas translate mismatch vs reference"

    print("KERNEL_OK")
</pallas_src>

<mosaic_0001>
module attributes {stable_mosaic.version = 11 : i64} {
  func.func @_translate_kernel(%arg0: i32, %arg1: memref<4xi32, #tpu.memory_space<smem>>, %arg2: memref<4x16x128xf32, #tpu.memory_space<vmem>>, %arg3: memref<4x16x128xf32, #tpu.memory_space<vmem>>) attributes {dimension_semantics = [#tpu.dimension_semantics<parallel>], iteration_bounds = array<i64: 1>, scalar_prefetch = 1 : i64, scratch_operands = 0 : i64, tpu.core_type = #tpu.core_type<tc>, window_params = [{transform_indices = @transform_0, window_bounds = array<i64: 4, 16, 128>}, {transform_indices = @transform_1, window_bounds = array<i64: 4, 16, 128>}]} {
    %c4_i32 = arith.constant 4 : i32
    %0 = arith.muli %arg0, %c4_i32 : i32
    %1 = tpu.iota {dimensions = array<i32: 0>} : vector<16x1xi32>
    %c-8_i32 = arith.constant -8 : i32
    %2 = vector.broadcast %c-8_i32 : i32 to vector<16x1xi32>
    %3 = arith.cmpi sge, %1, %2 : vector<16x1xi32>
    %c8_i32 = arith.constant 8 : i32
    %4 = vector.broadcast %c8_i32 : i32 to vector<16x1xi32>
    %5 = arith.cmpi slt, %1, %4 : vector<16x1xi32>
    %6 = arith.andi %3, %5 : vector<16x1xi1>
    %7 = tpu.iota {dimensions = array<i32: 1>} : vector<1x128xi32>
    %c32_i32 = arith.constant 32 : i32
    %8 = vector.broadcast %c32_i32 : i32 to vector<1x128xi32>
    %9 = arith.cmpi sge, %7, %8 : vector<1x128xi32>
    %c160_i32 = arith.constant 160 : i32
    %10 = vector.broadcast %c160_i32 : i32 to vector<1x128xi32>
    %11 = arith.cmpi slt, %7, %10 : vector<1x128xi32>
    %12 = arith.andi %9, %11 : vector<1x128xi1>
    %13 = vector.broadcast %6 : vector<16x1xi1> to vector<16x128xi1>
    %14 = vector.broadcast %12 : vector<1x128xi1> to vector<16x128xi1>
    %15 = arith.andi %13, %14 : vector<16x128xi1>
    %c0 = arith.constant 0 : index
    %c0_0 = arith.constant 0 : index
    %c0_1 = arith.constant 0 : index
    %16 = vector.load %arg2[%c0, %c0_0, %c0_1] : memref<4x16x128xf32, #tpu.memory_space<vmem>>, vector<1x16x128xf32>
    %17 = vector.shape_cast %16 : vector<1x16x128xf32> to vector<16x128xf32>
    %c32_i32_2 = arith.constant 32 : i32
    %18 = tpu.dynamic_rotate %17 by %c32_i32_2 dim 1 : vector<16x128xf32>, i32 -> vector<16x128xf32>
    %c8_i32_3 = arith.constant 8 : i32
    %19 = tpu.dynamic_rotate %18 by %c8_i32_3 dim 0 : vector<16x128xf32>, i32 -> vector<16x128xf32>
    %cst = arith.constant 0.000000e+00 : f32
    %20 = vector.broadcast %cst : f32 to vector<16x128xf32>
    %21 = arith.select %15, %19, %20 : vector<16x128xi1>, vector<16x128xf32>
    %c0_i32 = arith.constant 0 : i32
    %22 = arith.addi %0, %c0_i32 : i32
    %23 = arith.index_cast %22 : i32 to index
    %24 = memref.load %arg1[%23] : memref<4xi32, #tpu.memory_space<smem>>
    %c0_i32_4 = arith.constant 0 : i32
    %25 = arith.cmpi ne, %24, %c0_i32_4 : i32
    %26 = arith.select %25, %21, %17 : vector<16x128xf32>
    %c0_5 = arith.constant 0 : index
    %c0_6 = arith.constant 0 : index
    %c0_7 = arith.constant 0 : index
    %27 = vector.load %arg3[%c0_5, %c0_6, %c0_7] : memref<4x16x128xf32, #tpu.memory_space<vmem>>, vector<1x16x128xf32>
    %28 = vector.shape_cast %27 : vector<1x16x128xf32> to vector<16x128xf32>
    %29 = vector.shape_cast %26 : vector<16x128xf32> to vector<1x16x128xf32>
    tpu.vector_store %arg3[%c0_5, %c0_6, %c0_7], %29 {strides = array<i32>} : memref<4x16x128xf32, #tpu.memory_space<vmem>>, vector<1x16x128xf32>,
    %c1 = arith.constant 1 : index
    %c0_8 = arith.constant 0 : index
    %c0_9 = arith.constant 0 : index
    %30 = vector.load %arg2[%c1, %c0_8, %c0_9] : memref<4x16x128xf32, #tpu.memory_space<vmem>>, vector<1x16x128xf32>
    %31 = vector.shape_cast %30 : vector<1x16x128xf32> to vector<16x128xf32>
    %c32_i32_10 = arith.constant 32 : i32
    %32 = tpu.dynamic_rotate %31 by %c32_i32_10 dim 1 : vector<16x128xf32>, i32 -> vector<16x128xf32>
    %c8_i32_11 = arith.constant 8 : i32
    %33 = tpu.dynamic_rotate %32 by %c8_i32_11 dim 0 : vector<16x128xf32>, i32 -> vector<16x128xf32>
    %cst_12 = arith.constant 0.000000e+00 : f32
    %34 = vector.broadcast %cst_12 : f32 to vector<16x128xf32>
    %35 = arith.select %15, %33, %34 : vector<16x128xi1>, vector<16x128xf32>
    %c1_i32 = arith.constant 1 : i32
    %36 = arith.addi %0, %c1_i32 : i32
    %37 = arith.index_cast %36 : i32 to index
    %38 = memref.load %arg1[%37] : memref<4xi32, #tpu.memory_space<smem>>
    %c0_i32_13 = arith.constant 0 : i32
    %39 = arith.cmpi ne, %38, %c0_i32_13 : i32
    %40 = arith.select %39, %35, %31 : vector<16x128xf32>
    %c1_14 = arith.constant 1 : index
    %c0_15 = arith.constant 0 : index
    %c0_16 = arith.constant 0 : index
    %41 = vector.load %arg3[%c1_14, %c0_15, %c0_16] : memref<4x16x128xf32, #tpu.memory_space<vmem>>, vector<1x16x128xf32>
    %42 = vector.shape_cast %41 : vector<1x16x128xf32> to vector<16x128xf32>
    %43 = vector.shape_cast %40 : vector<16x128xf32> to vector<1x16x128xf32>
    tpu.vector_store %arg3[%c1_14, %c0_15, %c0_16], %43 {strides = array<i32>} : memref<4x16x128xf32, #tpu.memory_space<vmem>>, vector<1x16x128xf32>,
    %c2 = arith.constant 2 : index
    %c0_17 = arith.constant 0 : index
    %c0_18 = arith.constant 0 : index
    %44 = vector.load %arg2[%c2, %c0_17, %c0_18] : memref<4x16x128xf32, #tpu.memory_space<vmem>>, vector<1x16x128xf32>
    %45 = vector.shape_cast %44 : vector<1x16x128xf32> to vector<16x128xf32>
    %c32_i32_19 = arith.constant 32 : i32
    %46 = tpu.dynamic_rotate %45 by %c32_i32_19 dim 1 : vector<16x128xf32>, i32 -> vector<16x128xf32>
    %c8_i32_20 = arith.constant 8 : i32
    %47 = tpu.dynamic_rotate %46 by %c8_i32_20 dim 0 : vector<16x128xf32>, i32 -> vector<16x128xf32>
    %cst_21 = arith.constant 0.000000e+00 : f32
    %48 = vector.broadcast %cst_21 : f32 to vector<16x128xf32>
    %49 = arith.select %15, %47, %48 : vector<16x128xi1>, vector<16x128xf32>
    %c2_i32 = arith.constant 2 : i32
    %50 = arith.addi %0, %c2_i32 : i32
    %51 = arith.index_cast %50 : i32 to index
    %52 = memref.load %arg1[%51] : memref<4xi32, #tpu.memory_space<smem>>
    %c0_i32_22 = arith.constant 0 : i32
    %53 = arith.cmpi ne, %52, %c0_i32_22 : i32
    %54 = arith.select %53, %49, %45 : vector<16x128xf32>
    %c2_23 = arith.constant 2 : index
    %c0_24 = arith.constant 0 : index
    %c0_25 = arith.constant 0 : index
    %55 = vector.load %arg3[%c2_23, %c0_24, %c0_25] : memref<4x16x128xf32, #tpu.memory_space<vmem>>, vector<1x16x128xf32>
    %56 = vector.shape_cast %55 : vector<1x16x128xf32> to vector<16x128xf32>
    %57 = vector.shape_cast %54 : vector<16x128xf32> to vector<1x16x128xf32>
    tpu.vector_store %arg3[%c2_23, %c0_24, %c0_25], %57 {strides = array<i32>} : memref<4x16x128xf32, #tpu.memory_space<vmem>>, vector<1x16x128xf32>,
    %c3 = arith.constant 3 : index
    %c0_26 = arith.constant 0 : index
    %c0_27 = arith.constant 0 : index
    %58 = vector.load %arg2[%c3, %c0_26, %c0_27] : memref<4x16x128xf32, #tpu.memory_space<vmem>>, vector<1x16x128xf32>
    %59 = vector.shape_cast %58 : vector<1x16x128xf32> to vector<16x128xf32>
    %c32_i32_28 = arith.constant 32 : i32
    %60 = tpu.dynamic_rotate %59 by %c32_i32_28 dim 1 : vector<16x128xf32>, i32 -> vector<16x128xf32>
    %c8_i32_29 = arith.constant 8 : i32
    %61 = tpu.dynamic_rotate %60 by %c8_i32_29 dim 0 : vector<16x128xf32>, i32 -> vector<16x128xf32>
    %cst_30 = arith.constant 0.000000e+00 : f32
    %62 = vector.broadcast %cst_30 : f32 to vector<16x128xf32>
    %63 = arith.select %15, %61, %62 : vector<16x128xi1>, vector<16x128xf32>
    %c3_i32 = arith.constant 3 : i32
    %64 = arith.addi %0, %c3_i32 : i32
    %65 = arith.index_cast %64 : i32 to index
    %66 = memref.load %arg1[%65] : memref<4xi32, #tpu.memory_space<smem>>
    %c0_i32_31 = arith.constant 0 : i32
    %67 = arith.cmpi ne, %66, %c0_i32_31 : i32
    %68 = arith.select %67, %63, %59 : vector<16x128xf32>
    %c3_32 = arith.constant 3 : index
    %c0_33 = arith.constant 0 : index
    %c0_34 = arith.constant 0 : index
    %69 = vector.load %arg3[%c3_32, %c0_33, %c0_34] : memref<4x16x128xf32, #tpu.memory_space<vmem>>, vector<1x16x128xf32>
    %70 = vector.shape_cast %69 : vector<1x16x128xf32> to vector<16x128xf32>
    %71 = vector.shape_cast %68 : vector<16x128xf32> to vector<1x16x128xf32>
    tpu.vector_store %arg3[%c3_32, %c0_33, %c0_34], %71 {strides = array<i32>} : memref<4x16x128xf32, #tpu.memory_space<vmem>>, vector<1x16x128xf32>,
    return
  }
  func.func @transform_0(%arg0: i32, %arg1: memref<4xi32, #tpu.memory_space<smem>>) -> (i32, i32, i32) {
    %c0_i32 = arith.constant 0 : i32
    %c0_i32_0 = arith.constant 0 : i32
    %c0_i32_1 = arith.constant 0 : i32
    return %arg0, %c0_i32, %c0_i32_0 : i32, i32, i32
  }
  func.func @transform_1(%arg0: i32, %arg1: memref<4xi32, #tpu.memory_space<smem>>) -> (i32, i32, i32) {
    %c0_i32 = arith.constant 0 : i32
    %c0_i32_0 = arith.constant 0 : i32
    %c0_i32_1 = arith.constant 0 : i32
    return %arg0, %c0_i32, %c0_i32_0 : i32, i32, i32
  }
}

</mosaic_0001>

<bundles_post_ra>
// kernel: tpu_custom_call.1
= control target key start
LH: loop header
LB: loop body
LE: loop exit
PB: predicated region body
PF: predicated region fallthrough
CT: control target
= control target key end

     0   :  { %s313_s0 = inlined_call_operand.hbm [shape: s32[4], index: 0, kind: input, shape index: {}]   ;;  %s314_s1 = inlined_call_operand.hbm [shape: f32[4,16,128], index: 1, kind: input, shape index: {}]   ;;  %s315_s2 = inlined_call_operand.hbm [shape: f32[4,16,128], index: 2, kind: output, shape index: {}]  }
   0x1   :  { %s154_s11 = scalar_lea.hbm %s313_s0, 16 }
   0x2   :  { %p155_p0 = scmp.ne.s32.totalorder %s313_s0, %s154_s11  ;;  %p158_p1 = scmp.lt.u32.totalorder %s154_s11, %s313_s0 }
   0x4   :  { %p160_p2 = pnand %p158_p1, %p155_p0 }
   0x6   :  { %163 = shalt.err (!%p160_p2)  }
   0x7   :  { %s214_s16 = smov [#allocation3]  }
   0x8   :  { %8 = dma.hbm_to_smem %s313_s0, 16, %s214_s16, [#allocation2] }
   0x9   :  { %208 = dma.done.wait [#allocation2], 16 }
   0xa   :  { %209 = vsyncadd [#allocation2], 4294967280 }
   0xb   :  { %10 = sfence }
   0xc   :  { %11 = vsyncpa [#allocation5], 0 }
   0xd   :  { %12 = vsyncpa [#allocation6], 0  ;;  %s215_s19 = smov [#allocation4]   ;;  %s164_s23 = scalar_lea.hbm %s314_s1, 1024 }
   0xe   :  { %s18_s20 = sshll.u32 %s215_s19, 4  ;;  %p165_p3 = scmp.ne.s32.totalorder %s314_s1, %s164_s23  ;;  %s19_s20 = int_to_ptr.vmem [resolvable:$true] %s18_s20 }
   0xf   :  { %p168_p4 = scmp.lt.u32.totalorder %s164_s23, %s314_s1 }
  0x11   :  { %p170_p5 = pnand %p168_p4, %p165_p3 }
  0x13   :  { %173 = shalt.err (!%p170_p5)
}
  0x14   :  { %s174_s0 = scalar_lea.vmem %s19_s20, 1024  ;;  %p179_p7 = scmp.lt.s32.totalorder %s19_s20, %s19_s20 }
  0x15   :  { %p175_p6 = scmp.ne.s32.totalorder %s19_s20, %s174_s0  ;;  %p180_p8 = scmp.lt.s32.totalorder %s174_s0, %s174_s0 }
  0x17   :  { %p181_p9 = por %p180_p8, %p179_p7 }
  0x19   :  { %p182_p10 = pnand %p181_p9, %p175_p6 }
  0x1b   :  { %185 = shalt.err (!%p182_p10)
}
  0x1c   :  { %s216_s28 = smov 128   ;;  %s217_s29 = smov 8  }
  0x1d   :  { %24 = dma.hbm_to_vmem [thread:$0]  %s314_s1, 1024, %s19_s20, [#allocation5], %s216_s28, %s216_s28, %s217_s29  }
  0x1e   :  { %210 = dma.done.wait [#allocation5], 1024  }
  0x1f   :  { %211 = vsyncadd [#allocation5], 4294966272  ;;  %s146_s4 = sld [smem:[#allocation3 + $0x2]]  ;;  %s59_s5 = sld [smem:[#allocation3]]  ;;  %v90_v0 = vld [vmem:[#allocation4 + $0x28] sm:$0xff]  ;;  %v110_v2 = vld [vmem:[#allocation4 + $0x38] sm:$0xff]  ;;  %v38_v16 = vlaneseq }
  0x20   :  { %s147_s6 = sld [smem:[#allocation3 + $0x3]]  ;;  %s145_s7 = sld [smem:[#allocation3 + $0x1]]  ;;  %v52_v1 = vld [vmem:[#allocation4 + $0x8] sm:$0xff]  ;;  %v70_v3 = vld [vmem:[#allocation4 + $0x18] sm:$0xff]  ;;  %v89_v18 = vld [vmem:[#allocation4 + $0x20] sm:$0xff] }
  0x21   :  { %s218_s8 = smov 32   ;;  %v39_v17 = vand.u32 127, %v38_v16  ;;  %v51_v19 = vld [vmem:[#allocation4] sm:$0xff]  ;;  %s219_s12 = smov [#allocation7]   ;;  %v109_v26 = vld [vmem:[#allocation4 + $0x30] sm:$0xff] }
  0x22   :  { %93 = vrot.lane.b32.xlu1 %v90_v0, %s218_s8  ;;  %55 = vrot.lane.b32.xlu0 %v52_v1, %s218_s8  ;;  %s133_s13 = sshll.u32 %s219_s12, 4  ;;  %v69_v27 = vld [vmem:[#allocation4 + $0x10] sm:$0xff]  ;;  %s134_s13 = int_to_ptr.vmem [resolvable:$true] %s133_s13 }
  0x23   :  { %vm40_vm4 = vcmp.ge.s32.totalorder %v39_v17, 32  ;;  %s186_s14 = scalar_lea.vmem %s134_s13, 1024  ;;  %p191_p2 = scmp.lt.s32.totalorder %s134_s13, %s134_s13 }
  0x24   :  { %p187_p1 = scmp.ne.s32.totalorder %s134_s13, %s186_s14  ;;  %p192_p3 = scmp.lt.s32.totalorder %s186_s14, %s186_s14 }
  0x25   :  { %p99_p11 = scmp.ne.s32.totalorder %s146_s4, 0  ;;  %p60_p12 = scmp.ne.s32.totalorder %s59_s5, 0 }
  0x26   :  { %p119_p13 = scmp.ne.s32.totalorder %s147_s6, 0  ;;  %p79_p0 = scmp.ne.s32.totalorder %s145_s7, 0  ;;  %113 = vrot.lane.b32.xlu1 %v110_v2, %s218_s8  ;;  %73 = vrot.lane.b32.xlu0 %v70_v3, %s218_s8 }
  0x27   :  { %s100_s9 = scalar_select %p99_p11, 1, 0 }
  0x28   :  { %s61_s10 = scalar_select %p60_p12, 1, 0 }
  0x29   :  { %v101_v4 = vstv %s100_s9  ;;  %s120_s1 = scalar_select %p119_p13, 1, 0 }
  0x2a   :  { %vm262_vm0 = vcmp.eq.s32.totalorder %v101_v4, 1  ;;  %v62_v6 = vstv %s61_s10  ;;  %s80_s11 = scalar_select %p79_p0, 1, 0 }
  0x2b   :  { %v104_v7 = vsel %vm262_vm0, 0.0, %v90_v0  ;;  %vm268_vm1 = vcmp.eq.s32.totalorder %v62_v6, 1  ;;  %v121_v9 = vstv %s120_s1  ;;  %p193_p4 = por %p192_p3, %p191_p2 }
  0x2c   :  { %107 = vst [vmem:[#allocation7 + $0x28] sm:$0xff] %v104_v7  ;;  %v65_v10 = vsel %vm268_vm1, 0.0, %v52_v1  ;;  %vm274_vm2 = vcmp.eq.s32.totalorder %v121_v9, 1  ;;  %v81_v12 = vstv %s80_s11 }
  0x2d   :  { %67 = vst [vmem:[#allocation7 + $0x8] sm:$0xff] %v65_v10  ;;  %v124_v13 = vsel %vm274_vm2, 0.0, %v110_v2  ;;  %vm280_vm3 = vcmp.eq.s32.totalorder %v81_v12, 1  ;;  %p194_p5 = pnand %p193_p4, %p187_p1 }
  0x2e   :  { %127 = vst [vmem:[#allocation7 + $0x38] sm:$0xff] %v124_v13  ;;  %v84_v15 = vsel %vm280_vm3, 0.0, %v70_v3 }
  0x2f   :  { %87 = vst [vmem:[#allocation7 + $0x18] sm:$0xff] %v84_v15 }
  0x94   :  { %v94_v20 = vpop.permute.xlu1 %93  ;;  %v56_v21 = vpop.permute.xlu0 %55 }
  0x95   :  { %v95_v22 = vsel %vm40_vm4, %v94_v20, 0.0  ;;  %v57_v23 = vsel %vm40_vm4, %v56_v21, 0.0 }
  0x96   :  { %v103_v24 = vsel %vm262_vm0, %v95_v22, %v89_v18  ;;  %v64_v25 = vsel %vm268_vm1, %v57_v23, %v51_v19 }
  0x97   :  { %106 = vst [vmem:[#allocation7 + $0x20] sm:$0xff] %v103_v24  ;;  %66 = vst [vmem:[#allocation7] sm:$0xff] %v64_v25 }
  0x98   :  { %v114_v28 = vpop.permute.xlu1 %113  ;;  %v74_v29 = vpop.permute.xlu0 %73 }
  0x99   :  { %v115_v30 = vsel %vm40_vm4, %v114_v28, 0.0  ;;  %v75_v31 = vsel %vm40_vm4, %v74_v29, 0.0 }
  0x9a   :  { %v123_v32 = vsel %vm274_vm2, %v115_v30, %v109_v26  ;;  %v83_v33 = vsel %vm280_vm3, %v75_v31, %v69_v27 }
  0x9b   :  { %126 = vst [vmem:[#allocation7 + $0x30] sm:$0xff] %v123_v32  ;;  %86 = vst [vmem:[#allocation7 + $0x10] sm:$0xff] %v83_v33 }
  0x9c   :  { %197 = shalt.err (!%p194_p5)
}
  0x9d   :  { %s198_s17 = scalar_lea.hbm %s315_s2, 1024 }
  0x9e   :  { %p199_p6 = scmp.ne.s32.totalorder %s315_s2, %s198_s17  ;;  %p202_p7 = scmp.lt.u32.totalorder %s198_s17, %s315_s2 }
  0xa0   :  { %p204_p8 = pnand %p202_p7, %p199_p6 }
  0xa2   :  { %207 = shalt.err (!%p204_p8)
}
  0xa3   :  { %139 = dma.vmem_to_hbm [thread:$0]  %s134_s13, 1024, %s315_s2, [#allocation6], %s216_s28, %s216_s28, %s217_s29  }
  0xa4   :  { %212 = dma.done.wait [#allocation6], 1024  }
  0xa5   :  { %213 = vsyncadd [#allocation6], 4294966272 }
  0xa6   :  { %143 = vsyncpa [#allocation5], 1 }
  0xa7   :  { %144 = vsyncpa [#allocation6], 1 }

</bundles_post_ra>
